<compile_context>
chip_gen: v6e
topology: v6e:2x2x1
jax: 0.10.0
libtpu: 0.0.40
codegen_flags: <defaults>
</compile_context>

<pallas_src>
import jax
import jax.numpy as jnp
from jax.experimental import pallas as pl
from jax.experimental.pallas import tpu as pltpu


def _gradhead_kernel(x_ref, w_ref, b_ref, o_ref):
    # x_ref: (N, Cin, H*W)  VMEM  (lanes = H*W, sublanes = Cin)
    # w_ref: (Cout, Cin)    SMEM  scalar weight table
    # b_ref: (Cout,)        SMEM  scalar bias table
    # o_ref: (N, Cout, H*W) VMEM
    N, Cin, _ = x_ref.shape
    Cout = o_ref.shape[1]

    for n in range(N):
        # Load each input channel row once; (1, H*W) f32 vectors stay in vregs.
        rows = [x_ref[n, i:i + 1, :].astype(jnp.float32) for i in range(Cin)]
        for o in range(Cout):
            acc = w_ref[o, 0] * rows[0]
            for i in range(1, Cin):
                acc = acc + w_ref[o, i] * rows[i]
            # Bias added last (shorter serial dependency chain), lane-dense store.
            o_ref[n, o:o + 1, :] = (acc + b_ref[o]).astype(o_ref.dtype)


@jax.jit
def gradhead_forward(x_nchw, weight_oihw, bias):
    """Pallas implementation of GradHead.forward(x) = Conv2d(base, 3, kernel_size=1)(x).

    Args (PyTorch conventions):
      x_nchw:      (N, Cin, H, W)
      weight_oihw: (Cout, Cin, 1, 1) conv weight
      bias:        (Cout,)
    Returns: (N, Cout, H, W)
    """
    N, Cin, H, W = x_nchw.shape
    Cout = weight_oihw.shape[0]

    x3 = x_nchw.reshape(N, Cin, H * W)                 # free: NCHW is contiguous
    w = weight_oihw.reshape(Cout, Cin).astype(jnp.float32)
    b = bias.astype(jnp.float32)

    out3 = pl.pallas_call(
        _gradhead_kernel,
        out_shape=jax.ShapeDtypeStruct((N, Cout, H * W), x_nchw.dtype),
        in_specs=[
            pl.BlockSpec(memory_space=pltpu.MemorySpace.VMEM),
            pl.BlockSpec(memory_space=pltpu.MemorySpace.SMEM),
            pl.BlockSpec(memory_space=pltpu.MemorySpace.SMEM),
        ],
        out_specs=pl.BlockSpec(memory_space=pltpu.MemorySpace.VMEM),
    )(x3, w, b)

    return out3.reshape(N, Cout, H, W)


def _reference_forward(x_nchw, weight_oihw, bias):
    """Pure-JAX reference (matches torch.nn.Conv2d(base, 3, kernel_size=1))."""
    out = jax.lax.conv_general_dilated(
        x_nchw, weight_oihw,
        window_strides=(1, 1),
        padding="VALID",
        dimension_numbers=("NCHW", "OIHW", "NCHW"),
    )
    return out + bias.reshape(1, -1, 1, 1)


if __name__ == "__main__":
    base = 4            # input channels
    Cout = 3            # GradHead always maps to 3 output channels
    N, H, W = 2, 16, 16

    key = jax.random.PRNGKey(0)
    kx, kw, kb = jax.random.split(key, 3)

    x = jax.random.normal(kx, (N, base, H, W), dtype=jnp.float32)

    # Deterministic Conv2d(base, 3, kernel_size=1) parameters
    # (PyTorch-style uniform(-bound, bound) with bound = 1/sqrt(fan_in)).
    fan_in = base * 1 * 1
    bound = 1.0 / jnp.sqrt(jnp.float32(fan_in))
    weight = jax.random.uniform(kw, (Cout, base, 1, 1), jnp.float32, -bound, bound)
    bias = jax.random.uniform(kb, (Cout,), jnp.float32, -bound, bound)

    out = gradhead_forward(x, weight, bias)
    out = jax.block_until_ready(out)

    ref = _reference_forward(x, weight, bias)
    assert out.shape == (N, Cout, H, W)
    assert jnp.allclose(out, ref, atol=1e-5, rtol=1e-5), "mismatch vs reference"

    print("KERNEL_OK")
</pallas_src>

<mosaic_0001>
module attributes {stable_mosaic.version = 11 : i64} {
  func.func @_gradhead_kernel(%arg0: memref<2x4x256xf32, #tpu.memory_space<vmem>>, %arg1: memref<3x4xf32, #tpu.memory_space<smem>>, %arg2: memref<3xf32, #tpu.memory_space<smem>>, %arg3: memref<2x3x256xf32, #tpu.memory_space<vmem>>) attributes {dimension_semantics = [], scalar_prefetch = 0 : i64, scratch_operands = 0 : i64, tpu.core_type = #tpu.core_type<tc>} {
    %c0 = arith.constant 0 : index
    %c0_0 = arith.constant 0 : index
    %c0_1 = arith.constant 0 : index
    %0 = vector.load %arg0[%c0, %c0_0, %c0_1] : memref<2x4x256xf32, #tpu.memory_space<vmem>>, vector<1x1x256xf32>
    %1 = vector.shape_cast %0 : vector<1x1x256xf32> to vector<1x256xf32>
    %c0_2 = arith.constant 0 : index
    %c1 = arith.constant 1 : index
    %c0_3 = arith.constant 0 : index
    %2 = vector.load %arg0[%c0_2, %c1, %c0_3] : memref<2x4x256xf32, #tpu.memory_space<vmem>>, vector<1x1x256xf32>
    %3 = vector.shape_cast %2 : vector<1x1x256xf32> to vector<1x256xf32>
    %c0_4 = arith.constant 0 : index
    %c2 = arith.constant 2 : index
    %c0_5 = arith.constant 0 : index
    %4 = vector.load %arg0[%c0_4, %c2, %c0_5] : memref<2x4x256xf32, #tpu.memory_space<vmem>>, vector<1x1x256xf32>
    %5 = vector.shape_cast %4 : vector<1x1x256xf32> to vector<1x256xf32>
    %c0_6 = arith.constant 0 : index
    %c3 = arith.constant 3 : index
    %c0_7 = arith.constant 0 : index
    %6 = vector.load %arg0[%c0_6, %c3, %c0_7] : memref<2x4x256xf32, #tpu.memory_space<vmem>>, vector<1x1x256xf32>
    %7 = vector.shape_cast %6 : vector<1x1x256xf32> to vector<1x256xf32>
    %c0_8 = arith.constant 0 : index
    %c0_9 = arith.constant 0 : index
    %8 = memref.load %arg1[%c0_8, %c0_9] : memref<3x4xf32, #tpu.memory_space<smem>>
    %9 = vector.broadcast %8 : f32 to vector<1x256xf32>
    %10 = arith.mulf %9, %1 : vector<1x256xf32>
    %c0_10 = arith.constant 0 : index
    %c1_11 = arith.constant 1 : index
    %11 = memref.load %arg1[%c0_10, %c1_11] : memref<3x4xf32, #tpu.memory_space<smem>>
    %12 = vector.broadcast %11 : f32 to vector<1x256xf32>
    %13 = arith.mulf %12, %3 : vector<1x256xf32>
    %14 = arith.addf %10, %13 : vector<1x256xf32>
    %c0_12 = arith.constant 0 : index
    %c2_13 = arith.constant 2 : index
    %15 = memref.load %arg1[%c0_12, %c2_13] : memref<3x4xf32, #tpu.memory_space<smem>>
    %16 = vector.broadcast %15 : f32 to vector<1x256xf32>
    %17 = arith.mulf %16, %5 : vector<1x256xf32>
    %18 = arith.addf %14, %17 : vector<1x256xf32>
    %c0_14 = arith.constant 0 : index
    %c3_15 = arith.constant 3 : index
    %19 = memref.load %arg1[%c0_14, %c3_15] : memref<3x4xf32, #tpu.memory_space<smem>>
    %20 = vector.broadcast %19 : f32 to vector<1x256xf32>
    %21 = arith.mulf %20, %7 : vector<1x256xf32>
    %22 = arith.addf %18, %21 : vector<1x256xf32>
    %c0_16 = arith.constant 0 : index
    %23 = memref.load %arg2[%c0_16] : memref<3xf32, #tpu.memory_space<smem>>
    %24 = vector.broadcast %23 : f32 to vector<1x256xf32>
    %25 = arith.addf %22, %24 : vector<1x256xf32>
    %c0_17 = arith.constant 0 : index
    %c0_18 = arith.constant 0 : index
    %c0_19 = arith.constant 0 : index
    %26 = vector.load %arg3[%c0_17, %c0_18, %c0_19] : memref<2x3x256xf32, #tpu.memory_space<vmem>>, vector<1x1x256xf32>
    %27 = vector.shape_cast %26 : vector<1x1x256xf32> to vector<1x256xf32>
    %28 = vector.shape_cast %25 : vector<1x256xf32> to vector<1x1x256xf32>
    tpu.vector_store %arg3[%c0_17, %c0_18, %c0_19], %28 {strides = array<i32>} : memref<2x3x256xf32, #tpu.memory_space<vmem>>, vector<1x1x256xf32>,
    %c1_20 = arith.constant 1 : index
    %c0_21 = arith.constant 0 : index
    %29 = memref.load %arg1[%c1_20, %c0_21] : memref<3x4xf32, #tpu.memory_space<smem>>
    %30 = vector.broadcast %29 : f32 to vector<1x256xf32>
    %31 = arith.mulf %30, %1 : vector<1x256xf32>
    %c1_22 = arith.constant 1 : index
    %c1_23 = arith.constant 1 : index
    %32 = memref.load %arg1[%c1_22, %c1_23] : memref<3x4xf32, #tpu.memory_space<smem>>
    %33 = vector.broadcast %32 : f32 to vector<1x256xf32>
    %34 = arith.mulf %33, %3 : vector<1x256xf32>
    %35 = arith.addf %31, %34 : vector<1x256xf32>
    %c1_24 = arith.constant 1 : index
    %c2_25 = arith.constant 2 : index
    %36 = memref.load %arg1[%c1_24, %c2_25] : memref<3x4xf32, #tpu.memory_space<smem>>
    %37 = vector.broadcast %36 : f32 to vector<1x256xf32>
    %38 = arith.mulf %37, %5 : vector<1x256xf32>
    %39 = arith.addf %35, %38 : vector<1x256xf32>
    %c1_26 = arith.constant 1 : index
    %c3_27 = arith.constant 3 : index
    %40 = memref.load %arg1[%c1_26, %c3_27] : memref<3x4xf32, #tpu.memory_space<smem>>
    %41 = vector.broadcast %40 : f32 to vector<1x256xf32>
    %42 = arith.mulf %41, %7 : vector<1x256xf32>
    %43 = arith.addf %39, %42 : vector<1x256xf32>
    %c1_28 = arith.constant 1 : index
    %44 = memref.load %arg2[%c1_28] : memref<3xf32, #tpu.memory_space<smem>>
    %45 = vector.broadcast %44 : f32 to vector<1x256xf32>
    %46 = arith.addf %43, %45 : vector<1x256xf32>
    %c0_29 = arith.constant 0 : index
    %c1_30 = arith.constant 1 : index
    %c0_31 = arith.constant 0 : index
    %47 = vector.load %arg3[%c0_29, %c1_30, %c0_31] : memref<2x3x256xf32, #tpu.memory_space<vmem>>, vector<1x1x256xf32>
    %48 = vector.shape_cast %47 : vector<1x1x256xf32> to vector<1x256xf32>
    %49 = vector.shape_cast %46 : vector<1x256xf32> to vector<1x1x256xf32>
    tpu.vector_store %arg3[%c0_29, %c1_30, %c0_31], %49 {strides = array<i32>} : memref<2x3x256xf32, #tpu.memory_space<vmem>>, vector<1x1x256xf32>,
    %c2_32 = arith.constant 2 : index
    %c0_33 = arith.constant 0 : index
    %50 = memref.load %arg1[%c2_32, %c0_33] : memref<3x4xf32, #tpu.memory_space<smem>>
    %51 = vector.broadcast %50 : f32 to vector<1x256xf32>
    %52 = arith.mulf %51, %1 : vector<1x256xf32>
    %c2_34 = arith.constant 2 : index
    %c1_35 = arith.constant 1 : index
    %53 = memref.load %arg1[%c2_34, %c1_35] : memref<3x4xf32, #tpu.memory_space<smem>>
    %54 = vector.broadcast %53 : f32 to vector<1x256xf32>
    %55 = arith.mulf %54, %3 : vector<1x256xf32>
    %56 = arith.addf %52, %55 : vector<1x256xf32>
    %c2_36 = arith.constant 2 : index
    %c2_37 = arith.constant 2 : index
    %57 = memref.load %arg1[%c2_36, %c2_37] : memref<3x4xf32, #tpu.memory_space<smem>>
    %58 = vector.broadcast %57 : f32 to vector<1x256xf32>
    %59 = arith.mulf %58, %5 : vector<1x256xf32>
    %60 = arith.addf %56, %59 : vector<1x256xf32>
    %c2_38 = arith.constant 2 : index
    %c3_39 = arith.constant 3 : index
    %61 = memref.load %arg1[%c2_38, %c3_39] : memref<3x4xf32, #tpu.memory_space<smem>>
    %62 = vector.broadcast %61 : f32 to vector<1x256xf32>
    %63 = arith.mulf %62, %7 : vector<1x256xf32>
    %64 = arith.addf %60, %63 : vector<1x256xf32>
    %c2_40 = arith.constant 2 : index
    %65 = memref.load %arg2[%c2_40] : memref<3xf32, #tpu.memory_space<smem>>
    %66 = vector.broadcast %65 : f32 to vector<1x256xf32>
    %67 = arith.addf %64, %66 : vector<1x256xf32>
    %c0_41 = arith.constant 0 : index
    %c2_42 = arith.constant 2 : index
    %c0_43 = arith.constant 0 : index
    %68 = vector.load %arg3[%c0_41, %c2_42, %c0_43] : memref<2x3x256xf32, #tpu.memory_space<vmem>>, vector<1x1x256xf32>
    %69 = vector.shape_cast %68 : vector<1x1x256xf32> to vector<1x256xf32>
    %70 = vector.shape_cast %67 : vector<1x256xf32> to vector<1x1x256xf32>
    tpu.vector_store %arg3[%c0_41, %c2_42, %c0_43], %70 {strides = array<i32>} : memref<2x3x256xf32, #tpu.memory_space<vmem>>, vector<1x1x256xf32>,
    %c1_44 = arith.constant 1 : index
    %c0_45 = arith.constant 0 : index
    %c0_46 = arith.constant 0 : index
    %71 = vector.load %arg0[%c1_44, %c0_45, %c0_46] : memref<2x4x256xf32, #tpu.memory_space<vmem>>, vector<1x1x256xf32>
    %72 = vector.shape_cast %71 : vector<1x1x256xf32> to vector<1x256xf32>
    %c1_47 = arith.constant 1 : index
    %c1_48 = arith.constant 1 : index
    %c0_49 = arith.constant 0 : index
    %73 = vector.load %arg0[%c1_47, %c1_48, %c0_49] : memref<2x4x256xf32, #tpu.memory_space<vmem>>, vector<1x1x256xf32>
    %74 = vector.shape_cast %73 : vector<1x1x256xf32> to vector<1x256xf32>
    %c1_50 = arith.constant 1 : index
    %c2_51 = arith.constant 2 : index
    %c0_52 = arith.constant 0 : index
    %75 = vector.load %arg0[%c1_50, %c2_51, %c0_52] : memref<2x4x256xf32, #tpu.memory_space<vmem>>, vector<1x1x256xf32>
    %76 = vector.shape_cast %75 : vector<1x1x256xf32> to vector<1x256xf32>
    %c1_53 = arith.constant 1 : index
    %c3_54 = arith.constant 3 : index
    %c0_55 = arith.constant 0 : index
    %77 = vector.load %arg0[%c1_53, %c3_54, %c0_55] : memref<2x4x256xf32, #tpu.memory_space<vmem>>, vector<1x1x256xf32>
    %78 = vector.shape_cast %77 : vector<1x1x256xf32> to vector<1x256xf32>
    %c0_56 = arith.constant 0 : index
    %c0_57 = arith.constant 0 : index
    %79 = memref.load %arg1[%c0_56, %c0_57] : memref<3x4xf32, #tpu.memory_space<smem>>
    %80 = vector.broadcast %79 : f32 to vector<1x256xf32>
    %81 = arith.mulf %80, %72 : vector<1x256xf32>
    %c0_58 = arith.constant 0 : index
    %c1_59 = arith.constant 1 : index
    %82 = memref.load %arg1[%c0_58, %c1_59] : memref<3x4xf32, #tpu.memory_space<smem>>
    %83 = vector.broadcast %82 : f32 to vector<1x256xf32>
    %84 = arith.mulf %83, %74 : vector<1x256xf32>
    %85 = arith.addf %81, %84 : vector<1x256xf32>
    %c0_60 = arith.constant 0 : index
    %c2_61 = arith.constant 2 : index
    %86 = memref.load %arg1[%c0_60, %c2_61] : memref<3x4xf32, #tpu.memory_space<smem>>
    %87 = vector.broadcast %86 : f32 to vector<1x256xf32>
    %88 = arith.mulf %87, %76 : vector<1x256xf32>
    %89 = arith.addf %85, %88 : vector<1x256xf32>
    %c0_62 = arith.constant 0 : index
    %c3_63 = arith.constant 3 : index
    %90 = memref.load %arg1[%c0_62, %c3_63] : memref<3x4xf32, #tpu.memory_space<smem>>
    %91 = vector.broadcast %90 : f32 to vector<1x256xf32>
    %92 = arith.mulf %91, %78 : vector<1x256xf32>
    %93 = arith.addf %89, %92 : vector<1x256xf32>
    %c0_64 = arith.constant 0 : index
    %94 = memref.load %arg2[%c0_64] : memref<3xf32, #tpu.memory_space<smem>>
    %95 = vector.broadcast %94 : f32 to vector<1x256xf32>
    %96 = arith.addf %93, %95 : vector<1x256xf32>
    %c1_65 = arith.constant 1 : index
    %c0_66 = arith.constant 0 : index
    %c0_67 = arith.constant 0 : index
    %97 = vector.load %arg3[%c1_65, %c0_66, %c0_67] : memref<2x3x256xf32, #tpu.memory_space<vmem>>, vector<1x1x256xf32>
    %98 = vector.shape_cast %97 : vector<1x1x256xf32> to vector<1x256xf32>
    %99 = vector.shape_cast %96 : vector<1x256xf32> to vector<1x1x256xf32>
    tpu.vector_store %arg3[%c1_65, %c0_66, %c0_67], %99 {strides = array<i32>} : memref<2x3x256xf32, #tpu.memory_space<vmem>>, vector<1x1x256xf32>,
    %c1_68 = arith.constant 1 : index
    %c0_69 = arith.constant 0 : index
    %100 = memref.load %arg1[%c1_68, %c0_69] : memref<3x4xf32, #tpu.memory_space<smem>>
    %101 = vector.broadcast %100 : f32 to vector<1x256xf32>
    %102 = arith.mulf %101, %72 : vector<1x256xf32>
    %c1_70 = arith.constant 1 : index
    %c1_71 = arith.constant 1 : index
    %103 = memref.load %arg1[%c1_70, %c1_71] : memref<3x4xf32, #tpu.memory_space<smem>>
    %104 = vector.broadcast %103 : f32 to vector<1x256xf32>
    %105 = arith.mulf %104, %74 : vector<1x256xf32>
    %106 = arith.addf %102, %105 : vector<1x256xf32>
    %c1_72 = arith.constant 1 : index
    %c2_73 = arith.constant 2 : index
    %107 = memref.load %arg1[%c1_72, %c2_73] : memref<3x4xf32, #tpu.memory_space<smem>>
    %108 = vector.broadcast %107 : f32 to vector<1x256xf32>
    %109 = arith.mulf %108, %76 : vector<1x256xf32>
    %110 = arith.addf %106, %109 : vector<1x256xf32>
    %c1_74 = arith.constant 1 : index
    %c3_75 = arith.constant 3 : index
    %111 = memref.load %arg1[%c1_74, %c3_75] : memref<3x4xf32, #tpu.memory_space<smem>>
    %112 = vector.broadcast %111 : f32 to vector<1x256xf32>
    %113 = arith.mulf %112, %78 : vector<1x256xf32>
    %114 = arith.addf %110, %113 : vector<1x256xf32>
    %c1_76 = arith.constant 1 : index
    %115 = memref.load %arg2[%c1_76] : memref<3xf32, #tpu.memory_space<smem>>
    %116 = vector.broadcast %115 : f32 to vector<1x256xf32>
    %117 = arith.addf %114, %116 : vector<1x256xf32>
    %c1_77 = arith.constant 1 : index
    %c1_78 = arith.constant 1 : index
    %c0_79 = arith.constant 0 : index
    %118 = vector.load %arg3[%c1_77, %c1_78, %c0_79] : memref<2x3x256xf32, #tpu.memory_space<vmem>>, vector<1x1x256xf32>
    %119 = vector.shape_cast %118 : vector<1x1x256xf32> to vector<1x256xf32>
    %120 = vector.shape_cast %117 : vector<1x256xf32> to vector<1x1x256xf32>
    tpu.vector_store %arg3[%c1_77, %c1_78, %c0_79], %120 {strides = array<i32>} : memref<2x3x256xf32, #tpu.memory_space<vmem>>, vector<1x1x256xf32>,
    %c2_80 = arith.constant 2 : index
    %c0_81 = arith.constant 0 : index
    %121 = memref.load %arg1[%c2_80, %c0_81] : memref<3x4xf32, #tpu.memory_space<smem>>
    %122 = vector.broadcast %121 : f32 to vector<1x256xf32>
    %123 = arith.mulf %122, %72 : vector<1x256xf32>
    %c2_82 = arith.constant 2 : index
    %c1_83 = arith.constant 1 : index
    %124 = memref.load %arg1[%c2_82, %c1_83] : memref<3x4xf32, #tpu.memory_space<smem>>
    %125 = vector.broadcast %124 : f32 to vector<1x256xf32>
    %126 = arith.mulf %125, %74 : vector<1x256xf32>
    %127 = arith.addf %123, %126 : vector<1x256xf32>
    %c2_84 = arith.constant 2 : index
    %c2_85 = arith.constant 2 : index
    %128 = memref.load %arg1[%c2_84, %c2_85] : memref<3x4xf32, #tpu.memory_space<smem>>
    %129 = vector.broadcast %128 : f32 to vector<1x256xf32>
    %130 = arith.mulf %129, %76 : vector<1x256xf32>
    %131 = arith.addf %127, %130 : vector<1x256xf32>
    %c2_86 = arith.constant 2 : index
    %c3_87 = arith.constant 3 : index
    %132 = memref.load %arg1[%c2_86, %c3_87] : memref<3x4xf32, #tpu.memory_space<smem>>
    %133 = vector.broadcast %132 : f32 to vector<1x256xf32>
    %134 = arith.mulf %133, %78 : vector<1x256xf32>
    %135 = arith.addf %131, %134 : vector<1x256xf32>
    %c2_88 = arith.constant 2 : index
    %136 = memref.load %arg2[%c2_88] : memref<3xf32, #tpu.memory_space<smem>>
    %137 = vector.broadcast %136 : f32 to vector<1x256xf32>
    %138 = arith.addf %135, %137 : vector<1x256xf32>
    %c1_89 = arith.constant 1 : index
    %c2_90 = arith.constant 2 : index
    %c0_91 = arith.constant 0 : index
    %139 = vector.load %arg3[%c1_89, %c2_90, %c0_91] : memref<2x3x256xf32, #tpu.memory_space<vmem>>, vector<1x1x256xf32>
    %140 = vector.shape_cast %139 : vector<1x1x256xf32> to vector<1x256xf32>
    %141 = vector.shape_cast %138 : vector<1x256xf32> to vector<1x1x256xf32>
    tpu.vector_store %arg3[%c1_89, %c2_90, %c0_91], %141 {strides = array<i32>} : memref<2x3x256xf32, #tpu.memory_space<vmem>>, vector<1x1x256xf32>,
    return
  }
}

</mosaic_0001>

<bundles_post_ra>
// kernel: gradhead_forward.1
= control target key start
LH: loop header
LB: loop body
LE: loop exit
PB: predicated region body
PF: predicated region fallthrough
CT: control target
= control target key end

     0   :  { %8 = vsyncpa [#allocation3], 0  ;;  %s393_s0 = inlined_call_operand.vmem [shape: f32[2,4,256], index: 0, kind: input, shape index: {}]   ;;  %s394_s1 = inlined_call_operand.vmem [shape: f32[3,4], index: 1, kind: input, shape index: {}]   ;;  %s395_s2 = inlined_call_operand.vmem [shape: f32[3], index: 2, kind: input, shape index: {}]   ;;  %s396_s3 = inlined_call_operand.vmem [shape: f32[2,3,256], index: 3, kind: output, shape index: {}]  }
   0x1   :  { %s18_s14 = sshll.u32 %s394_s1, 4  ;;  %s19_s14 = int_to_ptr.vmem [resolvable:$true] %s18_s14 }
   0x2   :  { %9 = vsyncpa [#allocation5], 0  ;;  %s28_s17 = sshll.u32 %s395_s2, 4  ;;  %s228_s18 = scalar_lea.vmem %s19_s14, 64  ;;  %s29_s17 = int_to_ptr.vmem [resolvable:$true] %s28_s17 }
   0x3   :  { %p229_p0 = scmp.ne.s32.totalorder %s19_s14, %s228_s18  ;;  %p233_p1 = scmp.lt.s32.totalorder %s19_s14, %s19_s14 }
   0x4   :  { %p234_p2 = scmp.lt.s32.totalorder %s228_s18, %s228_s18 }
   0x6   :  { %p235_p3 = por %p234_p2, %p233_p1 }
   0x8   :  { %p236_p4 = pnand %p235_p3, %p229_p0 }
   0xa   :  { %239 = shalt.err (!%p236_p4)
}
   0xb   :  { %s256_s19 = smov [#allocation2]   ;;  %s240_s20 = scalar_lea.vmem %s29_s17, 16 }
   0xc   :  { %21 = dma.vmem_to_smem %s19_s14, 64, %s256_s19, [#allocation3]  }
   0xd   :  { %p241_p5 = scmp.ne.s32.totalorder %s29_s17, %s240_s20  ;;  %p245_p6 = scmp.lt.s32.totalorder %s29_s17, %s29_s17 }
   0xe   :  { %p246_p7 = scmp.lt.s32.totalorder %s240_s20, %s240_s20 }
  0x10   :  { %p247_p8 = por %p246_p7, %p245_p6 }
  0x12   :  { %p248_p9 = pnand %p247_p8, %p241_p5 }
  0x14   :  { %251 = shalt.err (!%p248_p9)
}
  0x15   :  { %s257_s1 = smov [#allocation4]  }
  0x16   :  { %31 = dma.vmem_to_smem %s29_s17, 16, %s257_s1, [#allocation5]  }
  0x17   :  { %252 = dma.done.wait [#allocation3], 64  }
  0x18   :  { %253 = vsyncadd [#allocation3], 4294967232 }
  0x19   :  { %254 = dma.done.wait [#allocation5], 16  }
  0x1a   :  { %255 = vsyncadd [#allocation5], 4294967280 }
  0x1b   :  { %38 = sfence }
  0x1c   :  { %s46_s2 = sld [smem:[#allocation2]]  ;;  %v39_v0 = vld [vmem:[%s393_s0] ss:$4 sm:$0x3]  ;;  %v64_v10 = vlaneseq }
  0x1d   :  { %s191_s21 = sld [smem:[#allocation2 + $0x1]]  ;;  %v188_v1 = vld [vmem:[%s393_s0 + $0x1] ss:$4 sm:$0x3] }
  0x1e   :  { %s192_s24 = sld [smem:[#allocation2 + $0x2]]  ;;  %v295_v2 = vld [vmem:[%s393_s0 + $0x2] ss:$4 sm:$0x3]  ;;  %vm335_vm0 = vcmp.lt.s32.totalorder %v64_v10, 256 }
  0x1f   :  { %s290_s27 = sld [smem:[#allocation2 + $0x3]]  ;;  %v206_v3 = vld [vmem:[%s393_s0 + $0x8] ss:$4 sm:$0x3] }
  0x20   :  { %s297_s30 = sld [smem:[#allocation4]]  ;;  %v307_v4 = vld [vmem:[%s393_s0 + $0x9] ss:$4 sm:$0x3] }
  0x21   :  { %s302_s6 = sld [smem:[#allocation2 + $0x80]]  ;;  %v314_v6 = vld [vmem:[%s393_s0 + $0xa] ss:$4 sm:$0x3] }
  0x22   :  { %v47_v5 = vstv %s46_s2  ;;  %s309_s9 = sld [smem:[#allocation2 + $0x81]]  ;;  %v190_v7 = vld [vmem:[%s393_s0 + $0x3] ss:$4 sm:$0x3] }
  0x23   :  { %v48_v8 = vmul.f32 %v47_v5, %v39_v0  ;;  %v50_v9 = vstv %s191_s21  ;;  %s319_s14 = sld [smem:[#allocation2 + $0x82]]  ;;  %v119_v11 = vmul.f32 %v206_v3, %v47_v5  ;;  %v209_v14 = vld [vmem:[%s393_s0 + $0xb] ss:$4 sm:$0x3] }
  0x24   :  { %v51_v12 = vmul.f32 %v188_v1, %v50_v9  ;;  %v54_v13 = vstv %s192_s24  ;;  %s321_s15 = sld [smem:[#allocation2 + $0x83]]  ;;  %v122_v15 = vmul.f32 %v307_v4, %v50_v9 }
  0x25   :  { %v55_v16 = vmul.f32 %v295_v2, %v54_v13  ;;  %v58_v17 = vstv %s290_s27  ;;  %s329_s18 = sld [smem:[#allocation4 + $0x1]]  ;;  %v126_v18 = vmul.f32 %v314_v6, %v54_v13 }
  0x26   :  { %v52_v19 = vadd.f32 %v51_v12, %v48_v8  ;;  %v59_v20 = vmul.f32 %v190_v7, %v58_v17  ;;  %s332_s19 = sld [smem:[#allocation2 + $0x100]]  ;;  %v123_v21 = vadd.f32 %v122_v15, %v119_v11  ;;  %v62_v22 = vstv %s297_s30 }
  0x27   :  { %v70_v24 = vstv %s302_s6  ;;  %s340_s0 = sld [smem:[#allocation2 + $0x101]]  ;;  %v130_v25 = vmul.f32 %v209_v14, %v58_v17 }
  0x28   :  { %v56_v26 = vadd.f32 %v55_v16, %v52_v19  ;;  %v71_v27 = vmul.f32 %v70_v24, %v39_v0  ;;  %v73_v28 = vstv %s309_s9  ;;  %s343_s20 = sld [smem:[#allocation2 + $0x102]]  ;;  %v127_v29 = vadd.f32 %v126_v18, %v123_v21 }
  0x29   :  { %v74_v30 = vmul.f32 %v188_v1, %v73_v28  ;;  %v77_v31 = vstv %s319_s14  ;;  %s346_s1 = sld [smem:[#allocation2 + $0x103]]  ;;  %v139_v32 = vmul.f32 %v206_v3, %v70_v24  ;;  %v142_v33 = vmul.f32 %v307_v4, %v73_v28 }
  0x2a   :  { %v60_v34 = vadd.f32 %v59_v20, %v56_v26  ;;  %v78_v35 = vmul.f32 %v295_v2, %v77_v31  ;;  %v81_v36 = vstv %s321_s15  ;;  %v131_v37 = vadd.f32 %v130_v25, %v127_v29  ;;  %s352_s2 = sld [smem:[#allocation4 + $0x2]] }
  0x2b   :  { %v75_v38 = vadd.f32 %v74_v30, %v71_v27  ;;  %v82_v39 = vmul.f32 %v190_v7, %v81_v36  ;;  %v85_v40 = vstv %s329_s18  ;;  %v143_v41 = vadd.f32 %v142_v33, %v139_v32 }
  0x2c   :  { %v63_v42 = vadd.f32 %v62_v22, %v60_v34  ;;  %v90_v43 = vstv %s332_s19  ;;  %v134_v44 = vadd.f32 %v131_v37, %v62_v22  ;;  %v146_v45 = vmul.f32 %v314_v6, %v77_v31 }
  0x2d   :  { %v79_v46 = vadd.f32 %v78_v35, %v75_v38  ;;  %v91_v47 = vmul.f32 %v90_v43, %v39_v0  ;;  %v93_v48 = vstv %s340_s0  ;;  %v150_v49 = vmul.f32 %v209_v14, %v81_v36 }
  0x2e   :  { %68 = vst.msk [vmem:[%s396_s3] ss:$4 sm:$0x3] %vm335_vm0, %v63_v42  ;;  %v94_v50 = vmul.f32 %v188_v1, %v93_v48  ;;  %v97_v51 = vstv %s343_s20  ;;  %213 = vst.msk [vmem:[%s396_s3 + $0x8] ss:$4 sm:$0x3] %vm335_vm0, %v134_v44  ;;  %v147_v52 = vadd.f32 %v146_v45, %v143_v41  ;;  %v159_v53 = vmul.f32 %v206_v3, %v90_v43 }
  0x2f   :  { %v83_v54 = vadd.f32 %v82_v39, %v79_v46  ;;  %v98_v55 = vmul.f32 %v295_v2, %v97_v51  ;;  %v101_v56 = vstv %s346_s1  ;;  %v162_v57 = vmul.f32 %v307_v4, %v93_v48 }
  0x30   :  { %v95_v58 = vadd.f32 %v94_v50, %v91_v47  ;;  %v102_v59 = vmul.f32 %v190_v7, %v101_v56  ;;  %v151_v60 = vadd.f32 %v150_v49, %v147_v52  ;;  %v166_v63 = vmul.f32 %v314_v6, %v97_v51 }
  0x31   :  { %v86_v61 = vadd.f32 %v85_v40, %v83_v54  ;;  %v163_v62 = vadd.f32 %v162_v57, %v159_v53  ;;  %v170_v0 = vmul.f32 %v209_v14, %v101_v56  ;;  %v105_v2 = vstv %s352_s2 }
  0x32   :  { %v99_v1 = vadd.f32 %v98_v55, %v95_v58  ;;  %v154_v5 = vadd.f32 %v151_v60, %v85_v40 }
  0x33   :  { %199 = vst.msk [vmem:[%s396_s3 + $0x1] ss:$4 sm:$0x3] %vm335_vm0, %v86_v61  ;;  %v167_v3 = vadd.f32 %v166_v63, %v163_v62 }
  0x34   :  { %v103_v8 = vadd.f32 %v102_v59, %v99_v1  ;;  %219 = vst.msk [vmem:[%s396_s3 + $0x9] ss:$4 sm:$0x3] %vm335_vm0, %v154_v5 }
  0x35   :  { %v171_v4 = vadd.f32 %v170_v0, %v167_v3 }
  0x36   :  { %v106_v6 = vadd.f32 %v105_v2, %v103_v8 }
  0x37   :  { %v174_v7 = vadd.f32 %v171_v4, %v105_v2 }
  0x38   :  { %205 = vst.msk [vmem:[%s396_s3 + $0x2] ss:$4 sm:$0x3] %vm335_vm0, %v106_v6 }
  0x39   :  { %225 = vst.msk [vmem:[%s396_s3 + $0xa] ss:$4 sm:$0x3] %vm335_vm0, %v174_v7 }
  0x3a   :  { %181 = vsyncpa [#allocation3], 1 }
  0x3b   :  { %182 = vsyncpa [#allocation5], 1 }

</bundles_post_ra>
